<compile_context>
chip_gen: v7x
topology: tpu7x:2x2x1
jax: 0.10.0
libtpu: 0.0.40
codegen_flags: <defaults>
</compile_context>

<pallas_src>
import jax
import jax.numpy as jnp
from jax.experimental import pallas as pl
from jax.experimental.pallas import tpu as pltpu

SUBLANE = 8  # sublane count of a vreg (batch tiles must be multiples of this)


def _round_up(x, m):
    return ((x + m - 1) // m) * m


def _softmax_last(x):
    # numerically stable softmax along the last (feature) axis; the approx
    # reciprocal lowers to the EUP slot (idle next to the exps), off the VALU
    # critical path.
    m = jnp.max(x, axis=-1, keepdims=True)
    e = jnp.exp(x - m)
    return e * pl.reciprocal(jnp.sum(e, axis=-1, keepdims=True), approx=True)


def mlp_kernel(x_ref, w1_ref, b1_ref, w2_ref, b2_ref, w3_ref, b3_ref, o_ref):
    bf16 = jnp.bfloat16  # MXU operands only; elementwise/softmax stays f32

    # fc1 + softmax
    h1 = jnp.dot(x_ref[...].astype(bf16), w1_ref[...].astype(bf16),
                 preferred_element_type=jnp.float32) + b1_ref[...]
    h1 = _softmax_last(h1)

    # fc2 + softmax
    h2 = jnp.dot(h1.astype(bf16), w2_ref[...].astype(bf16),
                 preferred_element_type=jnp.float32) + b2_ref[...]
    h2 = _softmax_last(h2)

    # out (no activation) — narrow (bm, out_features) store, masked vst is fine
    y = jnp.dot(h2.astype(bf16), w3_ref[...].astype(bf16),
                preferred_element_type=jnp.float32) + b3_ref[...]
    o_ref[...] = y.astype(o_ref.dtype)


def mlp_forward(x, w1, b1, w2, b2, w3, b3, *, block_m=1024):
    """Fused 3-layer MLP forward, tiled over batch with resident weights.

    Weights/biases may be passed as f32 or bf16 (the kernel casts at the dot
    inputs; passing bf16 additionally halves the resident-weight DMA).
    """
    batch, in_features = x.shape
    h1_dim = w1.shape[1]
    h2_dim = w2.shape[1]
    out_features = w3.shape[1]

    # --- batch tile: multiple of 8 sublanes, as large as block_m allows -------
    bm = min(block_m, _round_up(batch, SUBLANE))
    # Keep >= 4 grid steps (>= 2 per v7x TensorCore) once batch is big enough,
    # but never drop below 256-row tiles (per-step overhead would dominate).
    if pl.cdiv(batch, bm) < 4 and batch >= 4 * 256:
        bm = max(256, _round_up(pl.cdiv(batch, 4), SUBLANE))
    grid = pl.cdiv(batch, bm)

    # --- advisory cost estimate (helps XLA schedule neighboring ops) ----------
    flops = 2 * batch * (in_features * h1_dim + h1_dim * h2_dim + h2_dim * out_features)
    transcendentals = batch * (h1_dim + h2_dim + 2)  # exps + 2 approx recips / row
    bytes_accessed = (
        x.size * x.dtype.itemsize
        + sum(a.size * a.dtype.itemsize for a in (w1, b1, w2, b2, w3, b3))
        + batch * out_features * 4
    )

    row = lambda i: (i, 0)   # x / out: tiled over batch
    res = lambda i: (0, 0)   # weights / biases: whole-array resident blocks

    return pl.pallas_call(
        mlp_kernel,
        out_shape=jax.ShapeDtypeStruct((batch, out_features), jnp.float32),
        grid_spec=pltpu.PrefetchScalarGridSpec(
            num_scalar_prefetch=0,
            grid=(grid,),
            in_specs=[
                pl.BlockSpec((bm, in_features), row),
                pl.BlockSpec(w1.shape, res),
                pl.BlockSpec(b1.shape, res),
                pl.BlockSpec(w2.shape, res),
                pl.BlockSpec(b2.shape, res),
                pl.BlockSpec(w3.shape, res),
                pl.BlockSpec(b3.shape, res),
            ],
            out_specs=pl.BlockSpec((bm, out_features), row),
        ),
        compiler_params=pltpu.CompilerParams(
            dimension_semantics=("parallel",),     # shard batch tiles on v7x TCs
            vmem_limit_bytes=32 * 1024 * 1024,     # few-MiB footprint; leave headroom
        ),
        cost_estimate=pl.CostEstimate(
            flops=flops,
            transcendentals=transcendentals,
            bytes_accessed=bytes_accessed,
        ),
    )(x, w1, b1, w2, b2, w3, b3)


def init_params(key, in_features, h1, h2, out_features=3):
    """Deterministic PyTorch-Linear-style init (uniform +-1/sqrt(fan_in)).
    Weights are stored as (in_dim, out_dim) = transpose of torch layout."""
    ks = jax.random.split(key, 6)

    def lin(kw, kb, fan_in, fan_out):
        bound = 1.0 / jnp.sqrt(jnp.array(fan_in, jnp.float32))
        w = jax.random.uniform(kw, (fan_in, fan_out), jnp.float32, -bound, bound)
        b = jax.random.uniform(kb, (1, fan_out), jnp.float32, -bound, bound)
        return w, b

    w1, b1 = lin(ks[0], ks[1], in_features, h1)
    w2, b2 = lin(ks[2], ks[3], h1, h2)
    w3, b3 = lin(ks[4], ks[5], h2, out_features)
    return w1, b1, w2, b2, w3, b3


def reference_forward(x, w1, b1, w2, b2, w3, b3):
    h = jax.nn.softmax(x @ w1 + b1, axis=-1)
    h = jax.nn.softmax(h @ w2 + b2, axis=-1)
    return h @ w3 + b3


if __name__ == "__main__":
    # small shapes consistent with the module's forward
    batch, in_features, h1, h2, out_features = 8, 32, 64, 32, 3

    key = jax.random.PRNGKey(0)
    kx, kp = jax.random.split(key)
    x = jax.random.normal(kx, (batch, in_features), jnp.float32)
    params = init_params(kp, in_features, h1, h2, out_features)

    y = mlp_forward(x, *params)
    y = jax.block_until_ready(y)

    y_ref = reference_forward(x, *params)
    assert y.shape == (batch, out_features)
    # bf16 MXU operands + approx reciprocal in softmax -> relaxed tolerance
    # vs the exact f32 reference (observed error is O(1e-3)).
    assert jnp.allclose(y, y_ref, atol=1e-2, rtol=1e-2), "mismatch vs reference"

    print("KERNEL_OK")
</pallas_src>

<mosaic_0001>
module attributes {stable_mosaic.version = 11 : i64} {
  func.func @mlp_kernel(%arg0: i32, %arg1: memref<8x32xf32, #tpu.memory_space<vmem>>, %arg2: memref<32x64xf32, #tpu.memory_space<vmem>>, %arg3: memref<1x64xf32, #tpu.memory_space<vmem>>, %arg4: memref<64x32xf32, #tpu.memory_space<vmem>>, %arg5: memref<1x32xf32, #tpu.memory_space<vmem>>, %arg6: memref<32x3xf32, #tpu.memory_space<vmem>>, %arg7: memref<1x3xf32, #tpu.memory_space<vmem>>, %arg8: memref<8x3xf32, #tpu.memory_space<vmem>>) attributes {dimension_semantics = [#tpu.dimension_semantics<parallel>], iteration_bounds = array<i64: 1>, scalar_prefetch = 0 : i64, scratch_operands = 0 : i64, tpu.core_type = #tpu.core_type<tc>, window_params = [{transform_indices = @transform_0, window_bounds = array<i64: 8, 32>}, {pipeline_mode = #tpu.pipeline_mode<synchronous>, transform_indices = @transform_1, window_bounds = array<i64: 32, 64>}, {pipeline_mode = #tpu.pipeline_mode<synchronous>, transform_indices = @transform_2, window_bounds = array<i64: 1, 64>}, {pipeline_mode = #tpu.pipeline_mode<synchronous>, transform_indices = @transform_3, window_bounds = array<i64: 64, 32>}, {pipeline_mode = #tpu.pipeline_mode<synchronous>, transform_indices = @transform_4, window_bounds = array<i64: 1, 32>}, {pipeline_mode = #tpu.pipeline_mode<synchronous>, transform_indices = @transform_5, window_bounds = array<i64: 32, 3>}, {pipeline_mode = #tpu.pipeline_mode<synchronous>, transform_indices = @transform_6, window_bounds = array<i64: 1, 3>}, {transform_indices = @transform_7, window_bounds = array<i64: 8, 3>}]} {
    %c0 = arith.constant 0 : index
    %c0_0 = arith.constant 0 : index
    %0 = vector.load %arg1[%c0, %c0_0] : memref<8x32xf32, #tpu.memory_space<vmem>>, vector<8x32xf32>
    %1 = arith.truncf %0 : vector<8x32xf32> to vector<8x32xbf16>
    %c0_1 = arith.constant 0 : index
    %c0_2 = arith.constant 0 : index
    %2 = vector.load %arg2[%c0_1, %c0_2] : memref<32x64xf32, #tpu.memory_space<vmem>>, vector<32x64xf32>
    %3 = arith.truncf %2 : vector<32x64xf32> to vector<32x64xbf16>
    %cst = arith.constant dense<0.000000e+00> : vector<8x64xf32>
    %4 = tpu.matmul %1, %3, %cst {dimension_numbers = #tpu.dot_dimension_numbers<[1], [0], [0], [1], [0, 0, 1, 1], [], []>} : vector<8x32xbf16>, vector<32x64xbf16>, vector<8x64xf32> -> vector<8x64xf32>
    %c0_3 = arith.constant 0 : index
    %c0_4 = arith.constant 0 : index
    %5 = vector.load %arg3[%c0_3, %c0_4] : memref<1x64xf32, #tpu.memory_space<vmem>>, vector<1x64xf32>
    %6 = vector.broadcast %5 : vector<1x64xf32> to vector<8x64xf32>
    %7 = arith.addf %4, %6 : vector<8x64xf32>
    %cst_5 = arith.constant dense<0xFF800000> : vector<8xf32>
    %8 = vector.multi_reduction <maximumf>, %7, %cst_5 [1] : vector<8x64xf32> to vector<8xf32>
    %9 = vector.shape_cast %8 : vector<8xf32> to vector<8x1xf32>
    %10 = vector.broadcast %9 : vector<8x1xf32> to vector<8x64xf32>
    %11 = arith.subf %7, %10 : vector<8x64xf32>
    %12 = math.exp %11 : vector<8x64xf32>
    %cst_6 = arith.constant dense<0.000000e+00> : vector<8xf32>
    %13 = vector.multi_reduction <add>, %12, %cst_6 [1] : vector<8x64xf32> to vector<8xf32>
    %14 = vector.shape_cast %13 : vector<8xf32> to vector<8x1xf32>
    %15 = tpu.reciprocal %14 {approx = true} : vector<8x1xf32> -> vector<8x1xf32>
    %16 = vector.broadcast %15 : vector<8x1xf32> to vector<8x64xf32>
    %17 = arith.mulf %12, %16 : vector<8x64xf32>
    %18 = arith.truncf %17 : vector<8x64xf32> to vector<8x64xbf16>
    %c0_7 = arith.constant 0 : index
    %c0_8 = arith.constant 0 : index
    %19 = vector.load %arg4[%c0_7, %c0_8] : memref<64x32xf32, #tpu.memory_space<vmem>>, vector<64x32xf32>
    %20 = arith.truncf %19 : vector<64x32xf32> to vector<64x32xbf16>
    %cst_9 = arith.constant dense<0.000000e+00> : vector<8x32xf32>
    %21 = tpu.matmul %18, %20, %cst_9 {dimension_numbers = #tpu.dot_dimension_numbers<[1], [0], [0], [1], [0, 0, 1, 1], [], []>} : vector<8x64xbf16>, vector<64x32xbf16>, vector<8x32xf32> -> vector<8x32xf32>
    %c0_10 = arith.constant 0 : index
    %c0_11 = arith.constant 0 : index
    %22 = vector.load %arg5[%c0_10, %c0_11] : memref<1x32xf32, #tpu.memory_space<vmem>>, vector<1x32xf32>
    %23 = vector.broadcast %22 : vector<1x32xf32> to vector<8x32xf32>
    %24 = arith.addf %21, %23 : vector<8x32xf32>
    %cst_12 = arith.constant dense<0xFF800000> : vector<8xf32>
    %25 = vector.multi_reduction <maximumf>, %24, %cst_12 [1] : vector<8x32xf32> to vector<8xf32>
    %26 = vector.shape_cast %25 : vector<8xf32> to vector<8x1xf32>
    %27 = vector.broadcast %26 : vector<8x1xf32> to vector<8x32xf32>
    %28 = arith.subf %24, %27 : vector<8x32xf32>
    %29 = math.exp %28 : vector<8x32xf32>
    %cst_13 = arith.constant dense<0.000000e+00> : vector<8xf32>
    %30 = vector.multi_reduction <add>, %29, %cst_13 [1] : vector<8x32xf32> to vector<8xf32>
    %31 = vector.shape_cast %30 : vector<8xf32> to vector<8x1xf32>
    %32 = tpu.reciprocal %31 {approx = true} : vector<8x1xf32> -> vector<8x1xf32>
    %33 = vector.broadcast %32 : vector<8x1xf32> to vector<8x32xf32>
    %34 = arith.mulf %29, %33 : vector<8x32xf32>
    %35 = arith.truncf %34 : vector<8x32xf32> to vector<8x32xbf16>
    %c0_14 = arith.constant 0 : index
    %c0_15 = arith.constant 0 : index
    %36 = vector.load %arg6[%c0_14, %c0_15] : memref<32x3xf32, #tpu.memory_space<vmem>>, vector<32x3xf32>
    %37 = arith.truncf %36 : vector<32x3xf32> to vector<32x3xbf16>
    %cst_16 = arith.constant dense<0.000000e+00> : vector<8x3xf32>
    %38 = tpu.matmul %35, %37, %cst_16 {dimension_numbers = #tpu.dot_dimension_numbers<[1], [0], [0], [1], [0, 0, 1, 1], [], []>} : vector<8x32xbf16>, vector<32x3xbf16>, vector<8x3xf32> -> vector<8x3xf32>
    %c0_17 = arith.constant 0 : index
    %c0_18 = arith.constant 0 : index
    %39 = vector.load %arg7[%c0_17, %c0_18] : memref<1x3xf32, #tpu.memory_space<vmem>>, vector<1x3xf32>
    %40 = vector.broadcast %39 : vector<1x3xf32> to vector<8x3xf32>
    %41 = arith.addf %38, %40 : vector<8x3xf32>
    %c0_19 = arith.constant 0 : index
    %c0_20 = arith.constant 0 : index
    %42 = vector.load %arg8[%c0_19, %c0_20] : memref<8x3xf32, #tpu.memory_space<vmem>>, vector<8x3xf32>
    tpu.vector_store %arg8[%c0_19, %c0_20], %41 {strides = array<i32>} : memref<8x3xf32, #tpu.memory_space<vmem>>, vector<8x3xf32>,
    return
  }
  func.func @transform_0(%arg0: i32) -> (i32, i32) {
    %c0_i32 = arith.constant 0 : i32
    %c0_i32_0 = arith.constant 0 : i32
    return %arg0, %c0_i32 : i32, i32
  }
  func.func @transform_1(%arg0: i32) -> (i32, i32) {
    %c0_i32 = arith.constant 0 : i32
    %c0_i32_0 = arith.constant 0 : i32
    %c0_i32_1 = arith.constant 0 : i32
    return %c0_i32, %c0_i32_0 : i32, i32
  }
  func.func @transform_2(%arg0: i32) -> (i32, i32) {
    %c0_i32 = arith.constant 0 : i32
    %c0_i32_0 = arith.constant 0 : i32
    %c0_i32_1 = arith.constant 0 : i32
    return %c0_i32, %c0_i32_0 : i32, i32
  }
  func.func @transform_3(%arg0: i32) -> (i32, i32) {
    %c0_i32 = arith.constant 0 : i32
    %c0_i32_0 = arith.constant 0 : i32
    %c0_i32_1 = arith.constant 0 : i32
    return %c0_i32, %c0_i32_0 : i32, i32
  }
  func.func @transform_4(%arg0: i32) -> (i32, i32) {
    %c0_i32 = arith.constant 0 : i32
    %c0_i32_0 = arith.constant 0 : i32
    %c0_i32_1 = arith.constant 0 : i32
    return %c0_i32, %c0_i32_0 : i32, i32
  }
  func.func @transform_5(%arg0: i32) -> (i32, i32) {
    %c0_i32 = arith.constant 0 : i32
    %c0_i32_0 = arith.constant 0 : i32
    %c0_i32_1 = arith.constant 0 : i32
    return %c0_i32, %c0_i32_0 : i32, i32
  }
  func.func @transform_6(%arg0: i32) -> (i32, i32) {
    %c0_i32 = arith.constant 0 : i32
    %c0_i32_0 = arith.constant 0 : i32
    %c0_i32_1 = arith.constant 0 : i32
    return %c0_i32, %c0_i32_0 : i32, i32
  }
  func.func @transform_7(%arg0: i32) -> (i32, i32) {
    %c0_i32 = arith.constant 0 : i32
    %c0_i32_0 = arith.constant 0 : i32
    return %arg0, %c0_i32 : i32, i32
  }
}

</mosaic_0001>

<bundles_post_ra>
// kernel: tpu_custom_call.1
= control target key start
LH: loop header
LB: loop body
LE: loop exit
PB: predicated region body
PF: predicated region fallthrough
CT: control target
= control target key end

     0   :  { %v290_v0 = vmov 0.0   ;;  %vm291_vm0 = vmmov 0   ;;  %vm42_vm1 = vcmask 261120   ;;  %vm86_vm2 = vcmask 523264   ;;  %s416_s1 = inlined_call_operand.vmem [shape: f32[32,64], index: 1, kind: input, shape index: {}]   ;;  %s417_s0 = inlined_call_operand.vmem [shape: f32[8,32], index: 0, kind: input, shape index: {}]   ;;  %s418_s2 = inlined_call_operand.vmem [shape: f32[1,64], index: 2, kind: input, shape index: {}]   ;;  %s419_s3 = inlined_call_operand.vmem [shape: f32[64,32], index: 3, kind: input, shape index: {}]   ;;  %s420_s4 = inlined_call_operand.vmem [shape: f32[1,32], index: 4, kind: input, shape index: {}]   ;;  %s421_s5 = inlined_call_operand.vmem [shape: f32[32,3], index: 5, kind: input, shape index: {}]   ;;  %s422_s6 = inlined_call_operand.vmem [shape: f32[1,3], index: 6, kind: input, shape index: {}]   ;;  %s423_s7 = inlined_call_operand.vmem [shape: f32[8,3], index: 7, kind: output, shape index: {}]  }
   0x1   :  { %252 = vmatprep.subr.bf16.mxu0 %v290_v0  ;;  %v29_v1 = vld [vmem:[%s416_s1] sm:$0xff]  ;;  %v30_v2 = vld [vmem:[%s416_s1 + $0x8] sm:$0xff]  ;;  %v31_v3 = vld [vmem:[%s416_s1 + $0x10] sm:$0xff]  ;;  %256 = vmatprep.mubr.msk.bf16.mxu0 %vm291_vm0, %v290_v0  ;;  %vm229_vm3 = vcmask 23552  }
   0x2   :  { %v33_v4 = vpack.c.bf16 %v30_v2, %v29_v1  ;;  %v32_v5 = vld [vmem:[%s416_s1 + $0x18] sm:$0xff]  ;;  %260 = vmatprep.subr.bf16.mxu1 %v290_v0  ;;  %268 = vmatprep.mubr.msk.bf16.mxu1 %vm291_vm0, %v290_v0  ;;  %v27_v7 = vld [vmem:[%s417_s0] sm:$0xff]  ;;  %v100_v22 = vld [vmem:[%s419_s3 + $0x8] sm:$0xff] }
   0x3   :  { %v34_v6 = vpack.c.bf16 %v32_v5, %v31_v3  ;;  %v28_v8 = vpack.c.bf16 %v27_v7, %v27_v7  ;;  %v235_v9 = vld [vmem:[%s418_s2] ss:$0 sm:$0xff]  ;;  %v101_v24 = vld [vmem:[%s419_s3 + $0x10] sm:$0xff]  ;;  %v102_v25 = vld [vmem:[%s419_s3 + $0x18] sm:$0xff] }
   0x4   :  { %253 = vmatpush3.bf16.msra.mxu0 %v33_v4  ;;  %v99_v21 = vld [vmem:[%s419_s3] sm:$0xff]  ;;  %v108_v26 = vpack.c.bf16 %v102_v25, %v101_v24  ;;  %v104_v28 = vld [vmem:[%s419_s3 + $0x28] sm:$0xff]  ;;  %v105_v30 = vld [vmem:[%s419_s3 + $0x30] sm:$0xff] }
   0x5   :  { %254 = vmatprep.subr.bf16.mxu0 %v290_v0  ;;  %v107_v23 = vpack.c.bf16 %v100_v22, %v99_v21  ;;  %v103_v27 = vld [vmem:[%s419_s3 + $0x20] sm:$0xff]  ;;  %v106_v31 = vld [vmem:[%s419_s3 + $0x38] sm:$0xff]  ;;  %v174_v50 = vld [vmem:[%s421_s5 + $0x8] sm:$0xff] }
   0x6   :  { %v109_v29 = vpack.c.bf16 %v104_v28, %v103_v27  ;;  %v110_v32 = vpack.c.bf16 %v106_v31, %v105_v30  ;;  %v237_v37 = vld [vmem:[%s420_s4] ss:$0 sm:$0xff]  ;;  %v175_v52 = vld [vmem:[%s421_s5 + $0x10] sm:$0xff]  ;;  %v176_v53 = vld [vmem:[%s421_s5 + $0x18] sm:$0xff] }
   0x7   :  { %261 = vmatpush3.bf16.msra.mxu1 %v107_v23  ;;  %v173_v49 = vld [vmem:[%s421_s5] sm:$0xff]  ;;  %v178_v54 = vpack.c.bf16 %v176_v53, %v175_v52 }
   0x8   :  { %255 = vmatpush3.bf16.msra.mxu0 %v34_v6  ;;  %262 = vmatprep.subr.bf16.mxu1 %v290_v0  ;;  %v177_v51 = vpack.c.bf16 %v174_v50, %v173_v49  ;;  %v239_v59 = vld [vmem:[%s422_s6] ss:$0 sm:$0xff] }
   0x9   :  { %272 = vmatprep.subr.bf16.mxu0 %v290_v0 }
   0xb   :  { %257 = vmatmul.mubr.msk.bf16.vlgmr.msra.gmra.mrb[0].mxu0 %vm42_vm1, %v28_v8  ;;  %263 = vmatpush3.bf16.msra.mxu1 %v108_v26 }
   0xc   :  { %276 = vmatprep.mubr.msk.bf16.mxu0 %vm291_vm0, %v290_v0  ;;  %264 = vmatprep.subr.bf16.mxu1 %v290_v0 }
   0xd   :  { %273 = vmatpush3.bf16.msra.mxu0 %v177_v51 }
   0xe   :  { %274 = vmatprep.subr.bf16.mxu0 %v290_v0 }
   0xf   :  { %265 = vmatpush3.bf16.msra.mxu1 %v109_v29 }
  0x10   :  { %266 = vmatprep.subr.bf16.mxu1 %v290_v0 }
  0x11   :  { %275 = vmatpush3.bf16.msra.mxu0 %v178_v54 }
  0x13   :  { %267 = vmatpush3.bf16.msra.mxu1 %v110_v32 }
  0xde   :  { %v80_v10 = vpop.f32.mrb[0].mxu0 }
  0xdf   :  { %v81_v11 = vadd.f32 %v235_v9, %v80_v10  ;;  %v258_v12 = vpop.f32.mrb[1].mxu0 }
  0xe0   :  { %v83_v13 = vpop.f32.mrb[2].mxu0 }
  0xe1   :  { %v259_v14 = vpop.f32.mrb[3].mxu0  ;;  %v87_v15 = vsel %vm86_vm2, %v81_v11, -inf }
  0xe2   :  { %88 = vmax.xlane.f32.xlu0 %v87_v15 }
 0x16f   :  { %v89_v16 = vpop.xlane.xlu0 %88 }
 0x170   :  { %v90_v17 = vsub.f32 %v81_v11, %v89_v16 }
 0x172   :  { %v91_v18 = vmul.f32 1.442695, %v90_v17 }
 0x174   :  { %282 = vpow2.f32 %v91_v18 }
 0x17e   :  { %v283_v19 = vpop.eup %282 }
 0x17f   :  { %v93_v20 = vsel %vm86_vm2, %v283_v19, 0.0 }
 0x180   :  { %94 = vadd.xlane.f32.xlu0 %v93_v20 }
 0x20d   :  { %v95_v33 = vpop.xlane.xlu0 %94 }
 0x20e   :  { %284 = vrcp.f32 %v95_v33 }
 0x218   :  { %v285_v34 = vpop.eup %284 }
 0x219   :  { %v97_v35 = vmul.f32 %v285_v34, %v283_v19 }
 0x21b   :  { %v98_v36 = vpack.c.bf16 %v97_v35, %v97_v35 }
 0x21d   :  { %269 = vmatmul.mubr.msk.bf16.vlgmr.msra.gmra.mrb[0].mxu1 %vm86_vm2, %v98_v36 }
 0x2f0   :  { %v155_v38 = vpop.f32.mrb[0].mxu1 }
 0x2f1   :  { %v156_v39 = vadd.f32 %v237_v37, %v155_v38  ;;  %v270_v40 = vpop.f32.mrb[1].mxu1 }
 0x2f2   :  { %v158_v41 = vpop.f32.mrb[2].mxu1 }
 0x2f3   :  { %v271_v42 = vpop.f32.mrb[3].mxu1  ;;  %v161_v43 = vsel %vm42_vm1, %v156_v39, -inf }
 0x2f4   :  { %162 = vmax.xlane.f32.xlu1 %v161_v43 }
 0x381   :  { %v163_v44 = vpop.xlane.xlu1 %162 }
 0x382   :  { %v164_v45 = vsub.f32 %v156_v39, %v163_v44 }
 0x384   :  { %v165_v46 = vmul.f32 1.442695, %v164_v45 }
 0x386   :  { %286 = vpow2.f32 %v165_v46 }
 0x390   :  { %v287_v47 = vpop.eup %286 }
 0x391   :  { %v167_v48 = vsel %vm42_vm1, %v287_v47, 0.0 }
 0x392   :  { %168 = vadd.xlane.f32.xlu1 %v167_v48 }
 0x41f   :  { %v169_v55 = vpop.xlane.xlu1 %168 }
 0x420   :  { %288 = vrcp.f32 %v169_v55 }
 0x42a   :  { %v289_v56 = vpop.eup %288 }
 0x42b   :  { %v171_v57 = vmul.f32 %v289_v56, %v287_v47 }
 0x42d   :  { %v172_v58 = vpack.c.bf16 %v171_v57, %v171_v57 }
 0x42f   :  { %277 = vmatmul.mubr.msk.bf16.vlgmr.msra.gmra.mrb[4].mxu0 %vm42_vm1, %v172_v58 }
 0x502   :  { %v223_v60 = vpop.f32.mrb[4].mxu0 }
 0x503   :  { %v224_v61 = vadd.f32 %v239_v59, %v223_v60  ;;  %v278_v62 = vpop.f32.mrb[5].mxu0 }
 0x504   :  { %v226_v63 = vpop.f32.mrb[6].mxu0 }
 0x505   :  { %230 = vst.msk [vmem:[%s423_s7] sm:$0xff] %vm229_vm3, %v224_v61  ;;  %v279_v0 = vpop.f32.mrb[7].mxu0 }

</bundles_post_ra>
